<compile_context>
chip_gen: v6e
topology: v6e:2x2x1
jax: 0.10.0
libtpu: 0.0.40
codegen_flags: <defaults>
</compile_context>

<pallas_src>
import jax
import jax.numpy as jnp
from jax.experimental import pallas as pl
from jax.experimental.pallas import tpu as pltpu

EPS = 1e-5


def decoder_kernel(x_ref, w1_ref, w2_ref, w3_ref, p12_ref, p3w4_ref, b4_ref, o_ref):
    x = x_ref[...]
    p12 = p12_ref[...]      # rows: b1, g1, be1, b2, g2, be2     -> [6, hidden]
    p3w4 = p3w4_ref[...]    # rows: b3, g3, be3, w4^T (binary)   -> [3+binary, out_dim]
    b4 = b4_ref[...]        # [1, binary]
    binary = b4_ref.shape[1]

    def bn(h, gamma, beta):
        # training-mode BatchNorm1d, single-pass stats, folded affine
        inv_n = 1.0 / h.shape[0]
        s1 = jnp.sum(h, axis=0, keepdims=True)
        s2 = jnp.sum(h * h, axis=0, keepdims=True)
        mean = s1 * inv_n
        var = jnp.maximum(s2 * inv_n - mean * mean, 0.0)
        scale = gamma * jax.lax.rsqrt(var + EPS)
        shift = beta - mean * scale
        return h * scale + shift

    # fc1 -> ReLU -> BN1
    h = jnp.dot(x, w1_ref[...], preferred_element_type=jnp.float32) + p12[0:1]
    h = jnp.maximum(h, 0.0)
    h = bn(h, p12[1:2], p12[2:3])

    # fc2 -> ReLU -> BN2
    h = jnp.dot(h, w2_ref[...], preferred_element_type=jnp.float32) + p12[3:4]
    h = jnp.maximum(h, 0.0)
    h = bn(h, p12[4:5], p12[5:6])

    # fc3 -> ReLU -> BN3
    h = jnp.dot(h, w3_ref[...], preferred_element_type=jnp.float32) + p3w4[0:1]
    h = jnp.maximum(h, 0.0)
    h = bn(h, p3w4[1:2], p3w4[2:3])

    # fc4: for binary == 1 a VPU broadcast-mul + XLU lane reduce beats a
    # 1-column MXU matmul; otherwise fall back to the MXU.
    w4t = p3w4[3:]                                   # [binary, out_dim]
    if binary == 1:
        out = jnp.sum(h * w4t, axis=-1, keepdims=True) + b4
    else:
        out = jnp.dot(h, w4t.T, preferred_element_type=jnp.float32) + b4
    o_ref[...] = out.astype(o_ref.dtype)


def decoder_forward(x, params):
    B, in_dim = x.shape
    hidden_dim = params["w1"].shape[1]
    out_dim = params["w3"].shape[1]
    binary = params["w4"].shape[1]

    # Pack the tiny per-layer vectors to cut the number of HBM->VMEM DMAs.
    p12 = jnp.concatenate(
        [params["b1"], params["g1"], params["be1"],
         params["b2"], params["g2"], params["be2"]], axis=0)          # [6, hidden]
    p3w4 = jnp.concatenate(
        [params["b3"], params["g3"], params["be3"], params["w4"].T],
        axis=0)                                                       # [3+binary, out_dim]

    args = (x, params["w1"], params["w2"], params["w3"], p12, p3w4, params["b4"])

    flops = 2 * B * (in_dim * hidden_dim + hidden_dim * hidden_dim
                     + hidden_dim * out_dim + out_dim * binary)
    transcendentals = 2 * hidden_dim + out_dim          # one rsqrt per BN feature
    bytes_accessed = 4 * (sum(int(a.size) for a in args) + B * binary)

    return pl.pallas_call(
        decoder_kernel,
        out_shape=jax.ShapeDtypeStruct((B, binary), jnp.float32),
        # Whole arrays as single VMEM blocks (no grid): shapes are tiny.
        in_specs=[pl.BlockSpec(memory_space=pltpu.MemorySpace.VMEM)] * len(args),
        out_specs=pl.BlockSpec(memory_space=pltpu.MemorySpace.VMEM),
        cost_estimate=pl.CostEstimate(
            flops=flops,
            transcendentals=transcendentals,
            bytes_accessed=bytes_accessed),
    )(*args)


def make_params(key, in_dim, hidden_dim, out_dim, binary=1):
    ks = jax.random.split(key, 4)

    def lin(k, fan_in, fan_out):
        kw, kb = jax.random.split(k)
        bound = 1.0 / jnp.sqrt(fan_in)
        w = jax.random.uniform(kw, (fan_in, fan_out), jnp.float32, -bound, bound)
        b = jax.random.uniform(kb, (1, fan_out), jnp.float32, -bound, bound)
        return w, b

    w1, b1 = lin(ks[0], in_dim, hidden_dim)
    w2, b2 = lin(ks[1], hidden_dim, hidden_dim)
    w3, b3 = lin(ks[2], hidden_dim, out_dim)
    w4, b4 = lin(ks[3], out_dim, binary)
    return {
        "w1": w1, "b1": b1,
        "g1": jnp.ones((1, hidden_dim), jnp.float32), "be1": jnp.zeros((1, hidden_dim), jnp.float32),
        "w2": w2, "b2": b2,
        "g2": jnp.ones((1, hidden_dim), jnp.float32), "be2": jnp.zeros((1, hidden_dim), jnp.float32),
        "w3": w3, "b3": b3,
        "g3": jnp.ones((1, out_dim), jnp.float32), "be3": jnp.zeros((1, out_dim), jnp.float32),
        "w4": w4, "b4": b4,
    }


def decoder_reference(x, p):
    def bn(h, g, b):
        m = jnp.mean(h, axis=0, keepdims=True)
        v = jnp.mean((h - m) ** 2, axis=0, keepdims=True)
        return (h - m) / jnp.sqrt(v + EPS) * g + b

    h = bn(jnp.maximum(x @ p["w1"] + p["b1"], 0.0), p["g1"], p["be1"])
    h = bn(jnp.maximum(h @ p["w2"] + p["b2"], 0.0), p["g2"], p["be2"])
    h = bn(jnp.maximum(h @ p["w3"] + p["b3"], 0.0), p["g3"], p["be3"])
    return h @ p["w4"] + p["b4"]


if __name__ == "__main__":
    key = jax.random.PRNGKey(0)
    kx, kp = jax.random.split(key)

    B, in_dim, hidden_dim, out_dim, binary = 8, 16, 32, 16, 1
    x = jax.random.normal(kx, (B, in_dim), jnp.float32)
    params = make_params(kp, in_dim, hidden_dim, out_dim, binary)

    out = decoder_forward(x, params)
    out = jax.block_until_ready(out)

    ref = decoder_reference(x, params)
    assert out.shape == (B, binary)
    assert jnp.allclose(out, ref, atol=1e-4, rtol=1e-4), (
        f"mismatch: max abs err {jnp.max(jnp.abs(out - ref))}"
    )
    print("KERNEL_OK")
</pallas_src>

<mosaic_0001>
module attributes {stable_mosaic.version = 11 : i64} {
  func.func @decoder_kernel(%arg0: memref<8x16xf32, #tpu.memory_space<vmem>>, %arg1: memref<16x32xf32, #tpu.memory_space<vmem>>, %arg2: memref<32x32xf32, #tpu.memory_space<vmem>>, %arg3: memref<32x16xf32, #tpu.memory_space<vmem>>, %arg4: memref<6x32xf32, #tpu.memory_space<vmem>>, %arg5: memref<4x16xf32, #tpu.memory_space<vmem>>, %arg6: memref<1x1xf32, #tpu.memory_space<vmem>>, %arg7: memref<8x1xf32, #tpu.memory_space<vmem>>) attributes {dimension_semantics = [], scalar_prefetch = 0 : i64, scratch_operands = 0 : i64, tpu.core_type = #tpu.core_type<tc>} {
    %c0 = arith.constant 0 : index
    %c0_0 = arith.constant 0 : index
    %0 = vector.load %arg0[%c0, %c0_0] : memref<8x16xf32, #tpu.memory_space<vmem>>, vector<8x16xf32>
    %c0_1 = arith.constant 0 : index
    %c0_2 = arith.constant 0 : index
    %1 = vector.load %arg4[%c0_1, %c0_2] : memref<6x32xf32, #tpu.memory_space<vmem>>, vector<6x32xf32>
    %c0_3 = arith.constant 0 : index
    %c0_4 = arith.constant 0 : index
    %2 = vector.load %arg5[%c0_3, %c0_4] : memref<4x16xf32, #tpu.memory_space<vmem>>, vector<4x16xf32>
    %c0_5 = arith.constant 0 : index
    %c0_6 = arith.constant 0 : index
    %3 = vector.load %arg6[%c0_5, %c0_6] : memref<1x1xf32, #tpu.memory_space<vmem>>, vector<1x1xf32>
    %c0_7 = arith.constant 0 : index
    %c0_8 = arith.constant 0 : index
    %4 = vector.load %arg1[%c0_7, %c0_8] : memref<16x32xf32, #tpu.memory_space<vmem>>, vector<16x32xf32>
    %cst = arith.constant dense<0.000000e+00> : vector<8x32xf32>
    %5 = tpu.matmul %0, %4, %cst {dimension_numbers = #tpu.dot_dimension_numbers<[1], [0], [0], [1], [0, 0, 1, 1], [], []>} : vector<8x16xf32>, vector<16x32xf32>, vector<8x32xf32> -> vector<8x32xf32>
    %6 = vector.extract_strided_slice %1 {offsets = [0, 0], sizes = [1, 32], strides = [1, 1]} : vector<6x32xf32> to vector<1x32xf32>
    %7 = vector.broadcast %6 : vector<1x32xf32> to vector<8x32xf32>
    %8 = arith.addf %5, %7 : vector<8x32xf32>
    %cst_9 = arith.constant 0.000000e+00 : f32
    %9 = vector.broadcast %cst_9 : f32 to vector<8x32xf32>
    %10 = arith.maximumf %8, %9 : vector<8x32xf32>
    %11 = vector.extract_strided_slice %1 {offsets = [1, 0], sizes = [1, 32], strides = [1, 1]} : vector<6x32xf32> to vector<1x32xf32>
    %12 = vector.extract_strided_slice %1 {offsets = [2, 0], sizes = [1, 32], strides = [1, 1]} : vector<6x32xf32> to vector<1x32xf32>
    %cst_10 = arith.constant dense<0.000000e+00> : vector<32xf32>
    %13 = vector.multi_reduction <add>, %10, %cst_10 [0] : vector<8x32xf32> to vector<32xf32>
    %14 = vector.shape_cast %13 : vector<32xf32> to vector<1x32xf32>
    %15 = arith.mulf %10, %10 : vector<8x32xf32>
    %cst_11 = arith.constant dense<0.000000e+00> : vector<32xf32>
    %16 = vector.multi_reduction <add>, %15, %cst_11 [0] : vector<8x32xf32> to vector<32xf32>
    %17 = vector.shape_cast %16 : vector<32xf32> to vector<1x32xf32>
    %cst_12 = arith.constant 1.250000e-01 : f32
    %18 = vector.broadcast %cst_12 : f32 to vector<1x32xf32>
    %19 = arith.mulf %14, %18 : vector<1x32xf32>
    %cst_13 = arith.constant 1.250000e-01 : f32
    %20 = vector.broadcast %cst_13 : f32 to vector<1x32xf32>
    %21 = arith.mulf %17, %20 : vector<1x32xf32>
    %22 = arith.mulf %19, %19 : vector<1x32xf32>
    %23 = arith.subf %21, %22 : vector<1x32xf32>
    %cst_14 = arith.constant 0.000000e+00 : f32
    %24 = vector.broadcast %cst_14 : f32 to vector<1x32xf32>
    %25 = arith.maximumf %23, %24 : vector<1x32xf32>
    %cst_15 = arith.constant 9.99999974E-6 : f32
    %26 = vector.broadcast %cst_15 : f32 to vector<1x32xf32>
    %27 = arith.addf %25, %26 : vector<1x32xf32>
    %28 = math.rsqrt %27 : vector<1x32xf32>
    %29 = arith.mulf %11, %28 : vector<1x32xf32>
    %30 = arith.mulf %19, %29 : vector<1x32xf32>
    %31 = arith.subf %12, %30 : vector<1x32xf32>
    %32 = vector.broadcast %29 : vector<1x32xf32> to vector<8x32xf32>
    %33 = arith.mulf %10, %32 : vector<8x32xf32>
    %34 = vector.broadcast %31 : vector<1x32xf32> to vector<8x32xf32>
    %35 = arith.addf %33, %34 : vector<8x32xf32>
    %c0_16 = arith.constant 0 : index
    %c0_17 = arith.constant 0 : index
    %36 = vector.load %arg2[%c0_16, %c0_17] : memref<32x32xf32, #tpu.memory_space<vmem>>, vector<32x32xf32>
    %cst_18 = arith.constant dense<0.000000e+00> : vector<8x32xf32>
    %37 = tpu.matmul %35, %36, %cst_18 {dimension_numbers = #tpu.dot_dimension_numbers<[1], [0], [0], [1], [0, 0, 1, 1], [], []>} : vector<8x32xf32>, vector<32x32xf32>, vector<8x32xf32> -> vector<8x32xf32>
    %38 = vector.extract_strided_slice %1 {offsets = [3, 0], sizes = [1, 32], strides = [1, 1]} : vector<6x32xf32> to vector<1x32xf32>
    %39 = vector.broadcast %38 : vector<1x32xf32> to vector<8x32xf32>
    %40 = arith.addf %37, %39 : vector<8x32xf32>
    %cst_19 = arith.constant 0.000000e+00 : f32
    %41 = vector.broadcast %cst_19 : f32 to vector<8x32xf32>
    %42 = arith.maximumf %40, %41 : vector<8x32xf32>
    %43 = vector.extract_strided_slice %1 {offsets = [4, 0], sizes = [1, 32], strides = [1, 1]} : vector<6x32xf32> to vector<1x32xf32>
    %44 = vector.extract_strided_slice %1 {offsets = [5, 0], sizes = [1, 32], strides = [1, 1]} : vector<6x32xf32> to vector<1x32xf32>
    %cst_20 = arith.constant dense<0.000000e+00> : vector<32xf32>
    %45 = vector.multi_reduction <add>, %42, %cst_20 [0] : vector<8x32xf32> to vector<32xf32>
    %46 = vector.shape_cast %45 : vector<32xf32> to vector<1x32xf32>
    %47 = arith.mulf %42, %42 : vector<8x32xf32>
    %cst_21 = arith.constant dense<0.000000e+00> : vector<32xf32>
    %48 = vector.multi_reduction <add>, %47, %cst_21 [0] : vector<8x32xf32> to vector<32xf32>
    %49 = vector.shape_cast %48 : vector<32xf32> to vector<1x32xf32>
    %cst_22 = arith.constant 1.250000e-01 : f32
    %50 = vector.broadcast %cst_22 : f32 to vector<1x32xf32>
    %51 = arith.mulf %46, %50 : vector<1x32xf32>
    %cst_23 = arith.constant 1.250000e-01 : f32
    %52 = vector.broadcast %cst_23 : f32 to vector<1x32xf32>
    %53 = arith.mulf %49, %52 : vector<1x32xf32>
    %54 = arith.mulf %51, %51 : vector<1x32xf32>
    %55 = arith.subf %53, %54 : vector<1x32xf32>
    %cst_24 = arith.constant 0.000000e+00 : f32
    %56 = vector.broadcast %cst_24 : f32 to vector<1x32xf32>
    %57 = arith.maximumf %55, %56 : vector<1x32xf32>
    %cst_25 = arith.constant 9.99999974E-6 : f32
    %58 = vector.broadcast %cst_25 : f32 to vector<1x32xf32>
    %59 = arith.addf %57, %58 : vector<1x32xf32>
    %60 = math.rsqrt %59 : vector<1x32xf32>
    %61 = arith.mulf %43, %60 : vector<1x32xf32>
    %62 = arith.mulf %51, %61 : vector<1x32xf32>
    %63 = arith.subf %44, %62 : vector<1x32xf32>
    %64 = vector.broadcast %61 : vector<1x32xf32> to vector<8x32xf32>
    %65 = arith.mulf %42, %64 : vector<8x32xf32>
    %66 = vector.broadcast %63 : vector<1x32xf32> to vector<8x32xf32>
    %67 = arith.addf %65, %66 : vector<8x32xf32>
    %c0_26 = arith.constant 0 : index
    %c0_27 = arith.constant 0 : index
    %68 = vector.load %arg3[%c0_26, %c0_27] : memref<32x16xf32, #tpu.memory_space<vmem>>, vector<32x16xf32>
    %cst_28 = arith.constant dense<0.000000e+00> : vector<8x16xf32>
    %69 = tpu.matmul %67, %68, %cst_28 {dimension_numbers = #tpu.dot_dimension_numbers<[1], [0], [0], [1], [0, 0, 1, 1], [], []>} : vector<8x32xf32>, vector<32x16xf32>, vector<8x16xf32> -> vector<8x16xf32>
    %70 = vector.extract_strided_slice %2 {offsets = [0, 0], sizes = [1, 16], strides = [1, 1]} : vector<4x16xf32> to vector<1x16xf32>
    %71 = vector.broadcast %70 : vector<1x16xf32> to vector<8x16xf32>
    %72 = arith.addf %69, %71 : vector<8x16xf32>
    %cst_29 = arith.constant 0.000000e+00 : f32
    %73 = vector.broadcast %cst_29 : f32 to vector<8x16xf32>
    %74 = arith.maximumf %72, %73 : vector<8x16xf32>
    %75 = vector.extract_strided_slice %2 {offsets = [1, 0], sizes = [1, 16], strides = [1, 1]} : vector<4x16xf32> to vector<1x16xf32>
    %76 = vector.extract_strided_slice %2 {offsets = [2, 0], sizes = [1, 16], strides = [1, 1]} : vector<4x16xf32> to vector<1x16xf32>
    %cst_30 = arith.constant dense<0.000000e+00> : vector<16xf32>
    %77 = vector.multi_reduction <add>, %74, %cst_30 [0] : vector<8x16xf32> to vector<16xf32>
    %78 = vector.shape_cast %77 : vector<16xf32> to vector<1x16xf32>
    %79 = arith.mulf %74, %74 : vector<8x16xf32>
    %cst_31 = arith.constant dense<0.000000e+00> : vector<16xf32>
    %80 = vector.multi_reduction <add>, %79, %cst_31 [0] : vector<8x16xf32> to vector<16xf32>
    %81 = vector.shape_cast %80 : vector<16xf32> to vector<1x16xf32>
    %cst_32 = arith.constant 1.250000e-01 : f32
    %82 = vector.broadcast %cst_32 : f32 to vector<1x16xf32>
    %83 = arith.mulf %78, %82 : vector<1x16xf32>
    %cst_33 = arith.constant 1.250000e-01 : f32
    %84 = vector.broadcast %cst_33 : f32 to vector<1x16xf32>
    %85 = arith.mulf %81, %84 : vector<1x16xf32>
    %86 = arith.mulf %83, %83 : vector<1x16xf32>
    %87 = arith.subf %85, %86 : vector<1x16xf32>
    %cst_34 = arith.constant 0.000000e+00 : f32
    %88 = vector.broadcast %cst_34 : f32 to vector<1x16xf32>
    %89 = arith.maximumf %87, %88 : vector<1x16xf32>
    %cst_35 = arith.constant 9.99999974E-6 : f32
    %90 = vector.broadcast %cst_35 : f32 to vector<1x16xf32>
    %91 = arith.addf %89, %90 : vector<1x16xf32>
    %92 = math.rsqrt %91 : vector<1x16xf32>
    %93 = arith.mulf %75, %92 : vector<1x16xf32>
    %94 = arith.mulf %83, %93 : vector<1x16xf32>
    %95 = arith.subf %76, %94 : vector<1x16xf32>
    %96 = vector.broadcast %93 : vector<1x16xf32> to vector<8x16xf32>
    %97 = arith.mulf %74, %96 : vector<8x16xf32>
    %98 = vector.broadcast %95 : vector<1x16xf32> to vector<8x16xf32>
    %99 = arith.addf %97, %98 : vector<8x16xf32>
    %100 = vector.extract_strided_slice %2 {offsets = [3, 0], sizes = [1, 16], strides = [1, 1]} : vector<4x16xf32> to vector<1x16xf32>
    %101 = vector.broadcast %100 : vector<1x16xf32> to vector<8x16xf32>
    %102 = arith.mulf %99, %101 : vector<8x16xf32>
    %cst_36 = arith.constant dense<0.000000e+00> : vector<8xf32>
    %103 = vector.multi_reduction <add>, %102, %cst_36 [1] : vector<8x16xf32> to vector<8xf32>
    %104 = vector.shape_cast %103 : vector<8xf32> to vector<8x1xf32>
    %105 = vector.broadcast %3 : vector<1x1xf32> to vector<8x1xf32>
    %106 = arith.addf %104, %105 : vector<8x1xf32>
    %c0_37 = arith.constant 0 : index
    %c0_38 = arith.constant 0 : index
    %107 = vector.load %arg7[%c0_37, %c0_38] : memref<8x1xf32, #tpu.memory_space<vmem>>, vector<8x1xf32>
    tpu.vector_store %arg7[%c0_37, %c0_38], %106 {strides = array<i32>} : memref<8x1xf32, #tpu.memory_space<vmem>>, vector<8x1xf32>,
    return
  }
}

</mosaic_0001>

<bundles_post_ra>
// kernel: tpu_custom_call.1
= control target key start
LH: loop header
LB: loop body
LE: loop exit
PB: predicated region body
PF: predicated region fallthrough
CT: control target
= control target key end

     0   :  { %s683_s0 = inlined_call_operand.hbm [shape: f32[8,16], index: 0, kind: input, shape index: {}]   ;;  %s684_s1 = inlined_call_operand.vmem [shape: f32[16,32], index: 1, kind: input, shape index: {}]   ;;  %s685_s2 = inlined_call_operand.vmem [shape: f32[32,32], index: 2, kind: input, shape index: {}]   ;;  %s686_s3 = inlined_call_operand.vmem [shape: f32[32,16], index: 3, kind: input, shape index: {}]   ;;  %s687_s4 = inlined_call_operand.vmem [shape: f32[6,32], index: 4, kind: input, shape index: {}]   ;;  %s688_s5 = inlined_call_operand.hbm [shape: f32[4,16], index: 5, kind: input, shape index: {}]   ;;  %s689_s6 = inlined_call_operand.<no memory space> [shape: f32[1,1], index: 6, kind: input, shape index: {}]   ;;  %s690_s7 = inlined_call_operand.vmem [shape: f32[8,1], index: 7, kind: output, shape index: {}]  }
   0x1   :  { %v12_v0 = vstv %s689_s6 }
   0x2   :  { %13 = vst [vmem:[#allocation2] sm:$0x1] %v12_v0 }
   0x3   :  { %14 = vsyncpa [#allocation4], 0 }
   0x4   :  { %15 = vsyncpa [#allocation6], 0  ;;  %s539_s26 = smov [#allocation3]   ;;  %s540_s28 = smov [#allocation5]  }
   0x5   :  { %s22_s27 = sshll.u32 %s539_s26, 4  ;;  %s40_s29 = sshll.u32 %s540_s28, 4  ;;  %s23_s27 = int_to_ptr.vmem [resolvable:$true] %s22_s27  ;;  %s41_s29 = int_to_ptr.vmem [resolvable:$true] %s40_s29 }
   0x6   :  { %s503_s30 = scalar_lea.vmem %s23_s27, 128  ;;  %p508_p1 = scmp.lt.s32.totalorder %s23_s27, %s23_s27 }
   0x7   :  { %p504_p0 = scmp.ne.s32.totalorder %s23_s27, %s503_s30  ;;  %p509_p2 = scmp.lt.s32.totalorder %s503_s30, %s503_s30 }
   0x9   :  { %p510_p3 = por %p509_p2, %p508_p1 }
   0xb   :  { %p511_p4 = pnand %p510_p3, %p504_p0 }
   0xd   :  { %514 = shalt.err (!%p511_p4)
}
   0xe   :  { %25 = dma.hbm_to_vmem [thread:$0]  %s683_s0, 128, %s23_s27, [#allocation4]  }
   0xf   :  { %s523_s6 = scalar_lea.vmem %s41_s29, 64  ;;  %p528_p6 = scmp.lt.s32.totalorder %s41_s29, %s41_s29 }
  0x10   :  { %p524_p5 = scmp.ne.s32.totalorder %s41_s29, %s523_s6  ;;  %p529_p7 = scmp.lt.s32.totalorder %s523_s6, %s523_s6 }
  0x12   :  { %p530_p8 = por %p529_p7, %p528_p6 }
  0x14   :  { %p531_p9 = pnand %p530_p8, %p524_p5 }
  0x16   :  { %534 = shalt.err (!%p531_p9)
}
  0x17   :  { %43 = dma.hbm_to_vmem [thread:$0]  %s688_s5, 64, %s41_s29, [#allocation6]  }
  0x18   :  { %535 = dma.done.wait [#allocation4], 128  }
  0x19   :  { %536 = vsyncadd [#allocation4], 4294967168 }
  0x1a   :  { %537 = dma.done.wait [#allocation6], 64  }
  0x1b   :  { %538 = vsyncadd [#allocation6], 4294967232  ;;  %v541_v1 = vmov 0.0   ;;  %vm542_vm0 = vmmov 0   ;;  %v57_v2 = vld [vmem:[%s684_s1 + $0x8] sm:$0xff]  ;;  %v56_v3 = vld [vmem:[%s684_s1] sm:$0xff]  ;;  %v58_v9 = vlaneseq }
  0x1c   :  { %456 = vmatprep.subr.mxu0 %v541_v1  ;;  %460 = vmatprep.mubr.msk.f32.mxu0 %vm542_vm0, %v541_v1  ;;  %v52_v4 = vld [vmem:[#allocation3] sm:$0xff]  ;;  %vm62_vm1 = vcmask 130048   ;;  %v179_v5 = vld [vmem:[%s685_s2 + $0x18] sm:$0xff]  ;;  %v178_v6 = vld [vmem:[%s685_s2 + $0x10] sm:$0xff]  ;;  %vm137_vm2 = vcmask 261120   ;;  %vm431_vm3 = vcmask 7168  }
  0x1d   :  { %463 = vmatprep.subr.mxu1 %v541_v1  ;;  %471 = vmatprep.mubr.msk.f32.mxu1 %vm542_vm0, %v541_v1  ;;  %v177_v7 = vld [vmem:[%s685_s2 + $0x8] sm:$0xff]  ;;  %v176_v8 = vld [vmem:[%s685_s2] sm:$0xff]  ;;  %v621_v10 = vshrl.u32 %v58_v9, 7  ;;  %v299_v50 = vld [vmem:[%s686_s3 + $0x18] sm:$0xff] }
  0x1e   :  { %457 = vmatpush3.msra.mxu0 %v57_v2  ;;  %464 = vmatpush3.msra.mxu1 %v179_v5  ;;  %v627_v12 = vld [vmem:[%s687_s4] sm:$0x3f]  ;;  %v298_v51 = vld [vmem:[%s686_s3 + $0x10] sm:$0xff]  ;;  %v297_v52 = vld [vmem:[%s686_s3 + $0x8] sm:$0xff] }
  0x1f   :  { %458 = vmatprep.subr.mxu0 %v541_v1  ;;  %465 = vmatprep.subr.mxu1 %v541_v1  ;;  %v60_v11 = vsub.s32 0, %v621_v10  ;;  %v168_v41 = vsub.s32 1, %v621_v10  ;;  %v173_v45 = vsub.s32 2, %v621_v10  ;;  %v296_v53 = vld [vmem:[%s686_s3] sm:$0xff]  ;;  %v182_v54 = vsub.s32 3, %v621_v10 }
  0x20   :  { %459 = vmatpush3.msra.mxu0 %v56_v3  ;;  %466 = vmatpush3.msra.mxu1 %v178_v6 }
  0x21   :  { %461 = vmatmul.mubr.msk.f32.vlgmr.msra.gmra.mxu0 %vm62_vm1, %v52_v4  ;;  %474 = vmatprep.subr.mxu0 %v541_v1  ;;  %v61_v13 = vrot.slane %v627_v12, %v60_v11  ;;  %v183_v55 = vrot.slane %v627_v12, %v182_v54 }
  0x22   :  { %482 = vmatprep.mubr.msk.f32.mxu0 %vm542_vm0, %v541_v1  ;;  %467 = vmatprep.subr.mxu1 %v541_v1 }
  0x23   :  { %468 = vmatpush3.msra.mxu1 %v177_v7  ;;  %475 = vmatpush3.msra.mxu0 %v299_v50 }
  0x24   :  { %469 = vmatprep.subr.mxu1 %v541_v1  ;;  %476 = vmatprep.subr.mxu0 %v541_v1 }
  0x25   :  { %470 = vmatpush3.msra.mxu1 %v176_v8  ;;  %477 = vmatpush3.msra.mxu0 %v298_v51 }
  0x26   :  { %478 = vmatprep.subr.mxu0 %v541_v1 }
  0x27   :  { %479 = vmatpush3.msra.mxu0 %v297_v52 }
  0x28   :  { %480 = vmatprep.subr.mxu0 %v541_v1 }
  0x29   :  { %481 = vmatpush3.msra.mxu0 %v296_v53 }
  0xe1   :  { %v132_v14 = vpop.f32.mrf.mxu0 }
  0xe2   :  { %v133_v15 = vadd.f32 %v132_v14, %v61_v13 }
  0xe3   :  { %v462_v16 = vpop.f32.mrf.mxu0 }
  0xe4   :  { %v136_v17 = vmax.f32 %v133_v15, 0.0 }
  0xe6   :  { %v138_v18 = vsel %vm137_vm2, %v136_v17, 0.0  ;;  %v145_v19 = vmul.f32 %v136_v17, %v136_v17 }
  0xe7   :  { %v139_v20 = vrot.slane %v138_v18, 4 }
  0xe8   :  { %v146_v21 = vsel %vm137_vm2, %v145_v19, 0.0 }
  0xe9   :  { %v140_v22 = vadd.f32 %v139_v20, %v138_v18  ;;  %v147_v23 = vrot.slane %v146_v21, 4 }
  0xeb   :  { %v141_v24 = vrot.slane %v140_v22, 2  ;;  %v148_v25 = vadd.f32 %v147_v23, %v146_v21 }
  0xed   :  { %v142_v26 = vadd.f32 %v141_v24, %v140_v22  ;;  %v149_v27 = vrot.slane %v148_v25, 2  ;;  %v288_v22 = vsub.s32 4, %v621_v10 }
  0xef   :  { %v143_v28 = vrot.slane %v142_v26, 1  ;;  %v150_v29 = vadd.f32 %v149_v27, %v148_v25 }
  0xf1   :  { %v144_v30 = vadd.f32 %v143_v28, %v142_v26  ;;  %v151_v31 = vrot.slane %v150_v29, 1  ;;  %v293_v26 = vsub.s32 5, %v621_v10 }
  0xf3   :  { %v152_v32 = vadd.f32 %v151_v31, %v150_v29  ;;  %v153_v33 = vmul.f32 0.125, %v144_v30  ;;  %v54_v31 = vld [vmem:[#allocation5] sm:$0xf] }
  0xf5   :  { %v154_v34 = vmul.f32 0.125, %v152_v32  ;;  %v155_v35 = vmul.f32 %v153_v33, %v153_v33  ;;  %v303_v32 = vrot.slane %v54_v31, %v60_v11 }
  0xf7   :  { %v156_v36 = vsub.f32 %v154_v34, %v155_v35 }
  0xf9   :  { %v157_v37 = vmax.f32 %v156_v36, 0.0 }
  0xfb   :  { %v158_v38 = vadd.f32 1e-05, %v157_v37 }
  0xfd   :  { %489 = vrsqrt.f32 %v158_v38 }
 0x10a   :  { %v490_v39 = vpop.eup %489 }
 0x10b   :  { %v160_v40 = vmul.f32 %v490_v39, %v627_v12 }
 0x10d   :  { %v161_v42 = vmul.f32 %v160_v40, %v153_v33  ;;  %v169_v44 = vrot.slane %v160_v40, %v168_v41 }
 0x10f   :  { %v163_v43 = vrot.slane %v161_v42, 7  ;;  %v170_v47 = vmul.f32 %v169_v44, %v136_v17 }
 0x111   :  { %v165_v46 = vsub.f32 %v627_v12, %v163_v43 }
 0x113   :  { %v174_v48 = vrot.slane %v165_v46, %v173_v45 }
 0x115   :  { %v175_v49 = vadd.f32 %v174_v48, %v170_v47 }
 0x117   :  { %472 = vmatmul.mubr.msk.f32.vlgmr.msra.gmra.mxu1 %vm137_vm2, %v175_v49 }
 0x1d7   :  { %v253_v56 = vpop.f32.mrf.mxu1 }
 0x1d8   :  { %v254_v57 = vadd.f32 %v253_v56, %v183_v55 }
 0x1d9   :  { %v473_v58 = vpop.f32.mrf.mxu1 }
 0x1da   :  { %v257_v59 = vmax.f32 %v254_v57, 0.0 }
 0x1dc   :  { %v258_v60 = vsel %vm137_vm2, %v257_v59, 0.0  ;;  %v265_v61 = vmul.f32 %v257_v59, %v257_v59 }
 0x1dd   :  { %v259_v62 = vrot.slane %v258_v60, 4 }
 0x1de   :  { %v266_v63 = vsel %vm137_vm2, %v265_v61, 0.0 }
 0x1df   :  { %v260_v0 = vadd.f32 %v259_v62, %v258_v60  ;;  %v267_v1 = vrot.slane %v266_v63, 4 }
 0x1e1   :  { %v261_v2 = vrot.slane %v260_v0, 2  ;;  %v268_v3 = vadd.f32 %v267_v1, %v266_v63 }
 0x1e3   :  { %v262_v4 = vadd.f32 %v261_v2, %v260_v0  ;;  %v269_v5 = vrot.slane %v268_v3, 2 }
 0x1e5   :  { %v263_v6 = vrot.slane %v262_v4, 1  ;;  %v270_v7 = vadd.f32 %v269_v5, %v268_v3  ;;  %v419_v3 = vrot.slane %v54_v31, %v182_v54 }
 0x1e7   :  { %v264_v8 = vadd.f32 %v263_v6, %v262_v4  ;;  %v271_v9 = vrot.slane %v270_v7, 1 }
 0x1e9   :  { %v272_v13 = vadd.f32 %v271_v9, %v270_v7  ;;  %v273_v14 = vmul.f32 0.125, %v264_v8  ;;  %v442_v7 = vld [vmem:[#allocation2] ss:$0 sm:$0xff] }
 0x1eb   :  { %v274_v15 = vmul.f32 0.125, %v272_v13  ;;  %v275_v16 = vmul.f32 %v273_v14, %v273_v14 }
 0x1ed   :  { %v276_v17 = vsub.f32 %v274_v15, %v275_v16 }
 0x1ef   :  { %v277_v18 = vmax.f32 %v276_v17, 0.0 }
 0x1f1   :  { %v278_v19 = vadd.f32 1e-05, %v277_v18 }
 0x1f3   :  { %491 = vrsqrt.f32 %v278_v19 }
 0x200   :  { %v492_v20 = vpop.eup %491 }
 0x201   :  { %v280_v21 = vmul.f32 %v492_v20, %v627_v12 }
 0x203   :  { %v281_v23 = vmul.f32 %v280_v21, %v273_v14  ;;  %v289_v25 = vrot.slane %v280_v21, %v288_v22 }
 0x205   :  { %v283_v24 = vrot.slane %v281_v23, 7  ;;  %v290_v28 = vmul.f32 %v289_v25, %v257_v59 }
 0x207   :  { %v285_v27 = vsub.f32 %v627_v12, %v283_v24 }
 0x209   :  { %v294_v29 = vrot.slane %v285_v27, %v293_v26 }
 0x20b   :  { %v295_v30 = vadd.f32 %v294_v29, %v290_v28 }
 0x20d   :  { %483 = vmatmul.mubr.msk.f32.vlgmr.msra.gmra.mxu0 %vm137_vm2, %v295_v30 }
 0x2cd   :  { %v373_v33 = vpop.f32.mrf.mxu0 }
 0x2ce   :  { %v374_v34 = vadd.f32 %v373_v33, %v303_v32 }
 0x2cf   :  { %v484_v35 = vpop.f32.mrf.mxu0 }
 0x2d0   :  { %v377_v36 = vmax.f32 %v374_v34, 0.0 }
 0x2d2   :  { %v378_v37 = vsel %vm62_vm1, %v377_v36, 0.0  ;;  %v385_v38 = vmul.f32 %v377_v36, %v377_v36 }
 0x2d3   :  { %v379_v39 = vrot.slane %v378_v37, 4 }
 0x2d4   :  { %v386_v40 = vsel %vm62_vm1, %v385_v38, 0.0 }
 0x2d5   :  { %v380_v12 = vadd.f32 %v379_v39, %v378_v37  ;;  %v387_v42 = vrot.slane %v386_v40, 4 }
 0x2d7   :  { %v381_v43 = vrot.slane %v380_v12, 2  ;;  %v388_v44 = vadd.f32 %v387_v42, %v386_v40 }
 0x2d9   :  { %v382_v46 = vadd.f32 %v381_v43, %v380_v12  ;;  %v389_v47 = vrot.slane %v388_v44, 2 }
 0x2db   :  { %v383_v48 = vrot.slane %v382_v46, 1  ;;  %v390_v49 = vadd.f32 %v389_v47, %v388_v44 }
 0x2dd   :  { %v384_v50 = vadd.f32 %v383_v48, %v382_v46  ;;  %v391_v11 = vrot.slane %v390_v49, 1 }
 0x2df   :  { %v392_v51 = vadd.f32 %v391_v11, %v390_v49  ;;  %v393_v52 = vmul.f32 0.125, %v384_v50 }
 0x2e1   :  { %v394_v53 = vmul.f32 0.125, %v392_v51  ;;  %v395_v55 = vmul.f32 %v393_v52, %v393_v52 }
 0x2e3   :  { %v396_v56 = vsub.f32 %v394_v53, %v395_v55 }
 0x2e5   :  { %v397_v57 = vmax.f32 %v396_v56, 0.0 }
 0x2e7   :  { %v398_v58 = vadd.f32 1e-05, %v397_v57 }
 0x2e9   :  { %493 = vrsqrt.f32 %v398_v58 }
 0x2f6   :  { %v494_v59 = vpop.eup %493 }
 0x2f7   :  { %v400_v60 = vmul.f32 %v494_v59, %v54_v31 }
 0x2f9   :  { %v401_v61 = vmul.f32 %v400_v60, %v393_v52  ;;  %v409_v62 = vrot.slane %v400_v60, %v168_v41 }
 0x2fb   :  { %v403_v63 = vrot.slane %v401_v61, 7  ;;  %v410_v1 = vmul.f32 %v409_v62, %v377_v36 }
 0x2fd   :  { %v405_v0 = vsub.f32 %v54_v31, %v403_v63 }
 0x2ff   :  { %v414_v2 = vrot.slane %v405_v0, %v173_v45 }
 0x301   :  { %v415_v4 = vadd.f32 %v414_v2, %v410_v1 }
 0x303   :  { %v420_v5 = vmul.f32 %v419_v3, %v415_v4 }
 0x305   :  { %v421_v6 = vsel %vm62_vm1, %v420_v5, 0.0 }
 0x306   :  { %422 = vadd.xlane.f32.xlu0 %v421_v6 }
 0x38f   :  { %v423_v8 = vpop.xlane.xlu0 %422 }
 0x390   :  { %v430_v9 = vadd.f32 %v442_v7, %v423_v8 }
 0x392   :  { %432 = vst.msk [vmem:[%s690_s7] sm:$0xff] %vm431_vm3, %v430_v9 }
 0x393   :  { %437 = vsyncpa [#allocation4], 1 }
 0x394   :  { %438 = vsyncpa [#allocation6], 1 }

</bundles_post_ra>
